<compile_context>
chip_gen: v7x
topology: tpu7x:2x2x1
jax: 0.10.0
libtpu: 0.0.40
codegen_flags: <defaults>
</compile_context>

<pallas_src>
import jax
import jax.numpy as jnp
from jax.experimental import pallas as pl
from jax.experimental.pallas import tpu as pltpu

NEG_SLOPE = 0.01   # nn.LeakyReLU default
HIDDEN = 100       # logical hidden width (PyTorch module)
HPAD = 128         # lane-aligned padded hidden width


def _leaky_relu(x):
    return jnp.where(x > 0, x, NEG_SLOPE * x)


def _mlp_kernel(xT_ref, w1T_ref, w23T_ref, w4T_ref, b_ref, oT_ref):
    """Feature-major fused MLP: activations are [features, TILE_B]."""
    b = b_ref[...]                                   # [128, 4] f32, one bias vector per column
    h = xT_ref[...]                                  # [D, TILE_B] bf16 MXU operand (pre-cast)

    # fc1 + LeakyReLU (dropout = identity in eval mode)
    h = jnp.dot(w1T_ref[...], h, preferred_element_type=jnp.float32) + b[:, 0:1]
    h = _leaky_relu(h)

    # fc2 + LeakyReLU
    h = jnp.dot(w23T_ref[0], h.astype(jnp.bfloat16),
                preferred_element_type=jnp.float32) + b[:, 1:2]
    h = _leaky_relu(h)

    # fc3 + LeakyReLU
    h = jnp.dot(w23T_ref[1], h.astype(jnp.bfloat16),
                preferred_element_type=jnp.float32) + b[:, 2:3]
    h = _leaky_relu(h)

    # output layer (no activation); result is a lane-dense [1, TILE_B] row
    out = jnp.dot(w4T_ref[...], h.astype(jnp.bfloat16),
                  preferred_element_type=jnp.float32)
    oT_ref[...] = (out + b[0:1, 3:4]).astype(oT_ref.dtype)


def pack_params(params):
    """Pad hidden dim to 128, transpose to feature-major, cast weights to bf16,
    stack w2/w3 and pack all biases into one array. Done once, outside the kernel."""
    w1, w2, w3, w4 = params["w1"], params["w2"], params["w3"], params["w4"]
    b1, b2, b3, b4 = params["b1"], params["b2"], params["b3"], params["b4"]
    D = w1.shape[0]

    def pad2(a, rows, cols):
        return jnp.pad(a, ((0, rows - a.shape[0]), (0, cols - a.shape[1])))

    w1T = pad2(w1.T, HPAD, D).astype(jnp.bfloat16)                      # [128, D]
    w23T = jnp.stack([pad2(w2.T, HPAD, HPAD),
                      pad2(w3.T, HPAD, HPAD)]).astype(jnp.bfloat16)     # [2, 128, 128]
    w4T = pad2(w4.T, 1, HPAD).astype(jnp.bfloat16)                      # [1, 128]

    def pad_bias(b):
        return jnp.pad(b[0], (0, HPAD - b.shape[1]))                    # [128]

    b_packed = jnp.stack(
        [pad_bias(b1), pad_bias(b2), pad_bias(b3), pad_bias(b4)], axis=1
    ).astype(jnp.float32)                                               # [128, 4]

    return dict(w1T=w1T, w23T=w23T, w4T=w4T, b_packed=b_packed)


def feedforward_nn(x, packed, *, tile_b=512):
    """x: [B, input_dim] float32. packed: output of pack_params. Returns [B, 1] f32."""
    B, D = x.shape
    w1T, w23T, w4T, bp = packed["w1T"], packed["w23T"], packed["w4T"], packed["b_packed"]
    assert w1T.shape[1] == D, "input_dim mismatch between x and packed params"

    # Clamp the batch tile: no point padding tiny batches up to a huge tile.
    b_round = max(128, -(-B // 128) * 128)
    tile_b = min(tile_b, b_round)
    num_tiles = -(-B // tile_b)
    Bp = num_tiles * tile_b

    # Layout plumbing in XLA: pad batch, transpose to feature-major, cast to bf16
    # (halves the per-tile activation DMA — the only HBM stream that scales with B).
    xT = jnp.pad(x, ((0, Bp - B), (0, 0))).T.astype(jnp.bfloat16)       # [D, Bp] bf16

    outT = pl.pallas_call(
        _mlp_kernel,
        out_shape=jax.ShapeDtypeStruct((1, Bp), jnp.float32),
        grid=(num_tiles,),
        in_specs=[
            pl.BlockSpec((D, tile_b), lambda i: (0, i)),        # x^T, blocked over batch
            pl.BlockSpec(w1T.shape, lambda i: (0, 0)),          # weights stay VMEM-resident
            pl.BlockSpec(w23T.shape, lambda i: (0, 0, 0)),
            pl.BlockSpec(w4T.shape, lambda i: (0, 0)),
            pl.BlockSpec(bp.shape, lambda i: (0, 0)),           # packed biases (one DMA)
        ],
        out_specs=pl.BlockSpec((1, tile_b), lambda i: (0, i)),  # lane-dense output row
        compiler_params=pltpu.CompilerParams(
            dimension_semantics=("parallel",)),                 # megacore sharding on v7x
    )(xT, w1T, w23T, w4T, bp)

    return outT[0, :B].reshape(B, 1)


def init_params(key, input_dim, hidden=HIDDEN):
    """Deterministic init mimicking nn.Linear (uniform(-1/sqrt(fan_in), +))."""
    def linear(key, fan_in, fan_out):
        kw, kb = jax.random.split(key)
        bound = 1.0 / jnp.sqrt(fan_in)
        w = jax.random.uniform(kw, (fan_in, fan_out), jnp.float32, -bound, bound)
        b = jax.random.uniform(kb, (1, fan_out), jnp.float32, -bound, bound)
        return w, b

    k1, k2, k3, k4 = jax.random.split(key, 4)
    w1, b1 = linear(k1, input_dim, hidden)
    w2, b2 = linear(k2, hidden, hidden)
    w3, b3 = linear(k3, hidden, hidden)
    w4, b4 = linear(k4, hidden, 1)
    return dict(w1=w1, b1=b1, w2=w2, b2=b2, w3=w3, b3=b3, w4=w4, b4=b4)


def _reference(x, p):
    """Pure-JAX reference with the same bf16-operand / f32-accumulate numerics."""
    def layer(h, w, b):
        return jnp.dot(h.astype(jnp.bfloat16), w.astype(jnp.bfloat16),
                       preferred_element_type=jnp.float32) + b
    h = _leaky_relu(layer(x, p["w1"], p["b1"]))
    h = _leaky_relu(layer(h, p["w2"], p["b2"]))
    h = _leaky_relu(layer(h, p["w3"], p["b3"]))
    return layer(h, p["w4"], p["b4"])


if __name__ == "__main__":
    key = jax.random.PRNGKey(0)
    kx, kp = jax.random.split(key)

    B, input_dim = 256, 32
    x = jax.random.normal(kx, (B, input_dim), jnp.float32)
    params = init_params(kp, input_dim)
    packed = pack_params(params)

    out = feedforward_nn(x, packed, tile_b=128)   # grid=(2,): exercises pipelining / both TCs
    out = jax.block_until_ready(out)

    ref = _reference(x, params)
    assert out.shape == (B, 1), out.shape
    assert jnp.allclose(out, ref, atol=1e-2, rtol=1e-2), "mismatch vs JAX reference"

    print("KERNEL_OK")
</pallas_src>

<mosaic_0001>
module attributes {stable_mosaic.version = 11 : i64} {
  func.func @_mlp_kernel(%arg0: i32, %arg1: memref<32x128xbf16, #tpu.memory_space<vmem>>, %arg2: memref<128x32xbf16, #tpu.memory_space<vmem>>, %arg3: memref<2x128x128xbf16, #tpu.memory_space<vmem>>, %arg4: memref<1x128xbf16, #tpu.memory_space<vmem>>, %arg5: memref<128x4xf32, #tpu.memory_space<vmem>>, %arg6: memref<1x128xf32, #tpu.memory_space<vmem>>) attributes {dimension_semantics = [#tpu.dimension_semantics<parallel>], iteration_bounds = array<i64: 2>, scalar_prefetch = 0 : i64, scratch_operands = 0 : i64, tpu.core_type = #tpu.core_type<tc>, window_params = [{transform_indices = @transform_0, window_bounds = array<i64: 32, 128>}, {pipeline_mode = #tpu.pipeline_mode<synchronous>, transform_indices = @transform_1, window_bounds = array<i64: 128, 32>}, {pipeline_mode = #tpu.pipeline_mode<synchronous>, transform_indices = @transform_2, window_bounds = array<i64: 2, 128, 128>}, {pipeline_mode = #tpu.pipeline_mode<synchronous>, transform_indices = @transform_3, window_bounds = array<i64: 1, 128>}, {pipeline_mode = #tpu.pipeline_mode<synchronous>, transform_indices = @transform_4, window_bounds = array<i64: 128, 4>}, {transform_indices = @transform_5, window_bounds = array<i64: 1, 128>}]} {
    %c0 = arith.constant 0 : index
    %c0_0 = arith.constant 0 : index
    %0 = vector.load %arg5[%c0, %c0_0] : memref<128x4xf32, #tpu.memory_space<vmem>>, vector<128x4xf32>
    %c0_1 = arith.constant 0 : index
    %c0_2 = arith.constant 0 : index
    %1 = vector.load %arg1[%c0_1, %c0_2] : memref<32x128xbf16, #tpu.memory_space<vmem>>, vector<32x128xbf16>
    %c0_3 = arith.constant 0 : index
    %c0_4 = arith.constant 0 : index
    %2 = vector.load %arg2[%c0_3, %c0_4] : memref<128x32xbf16, #tpu.memory_space<vmem>>, vector<128x32xbf16>
    %cst = arith.constant dense<0.000000e+00> : vector<128x128xf32>
    %3 = tpu.matmul %2, %1, %cst {dimension_numbers = #tpu.dot_dimension_numbers<[1], [0], [0], [1], [0, 0, 1, 1], [], []>} : vector<128x32xbf16>, vector<32x128xbf16>, vector<128x128xf32> -> vector<128x128xf32>
    %4 = vector.extract_strided_slice %0 {offsets = [0, 0], sizes = [128, 1], strides = [1, 1]} : vector<128x4xf32> to vector<128x1xf32>
    %5 = vector.broadcast %4 : vector<128x1xf32> to vector<128x128xf32>
    %6 = arith.addf %3, %5 : vector<128x128xf32>
    %cst_5 = arith.constant 0.000000e+00 : f32
    %7 = vector.broadcast %cst_5 : f32 to vector<128x128xf32>
    %8 = arith.cmpf ogt, %6, %7 : vector<128x128xf32>
    %cst_6 = arith.constant 0.00999999977 : f32
    %9 = vector.broadcast %cst_6 : f32 to vector<128x128xf32>
    %10 = arith.mulf %9, %6 : vector<128x128xf32>
    %11 = arith.select %8, %6, %10 : vector<128x128xi1>, vector<128x128xf32>
    %c0_7 = arith.constant 0 : index
    %c0_8 = arith.constant 0 : index
    %c0_9 = arith.constant 0 : index
    %12 = vector.load %arg3[%c0_7, %c0_8, %c0_9] : memref<2x128x128xbf16, #tpu.memory_space<vmem>>, vector<1x128x128xbf16>
    %13 = vector.shape_cast %12 : vector<1x128x128xbf16> to vector<128x128xbf16>
    %14 = arith.truncf %11 : vector<128x128xf32> to vector<128x128xbf16>
    %cst_10 = arith.constant dense<0.000000e+00> : vector<128x128xf32>
    %15 = tpu.matmul %13, %14, %cst_10 {dimension_numbers = #tpu.dot_dimension_numbers<[1], [0], [0], [1], [0, 0, 1, 1], [], []>} : vector<128x128xbf16>, vector<128x128xbf16>, vector<128x128xf32> -> vector<128x128xf32>
    %16 = vector.extract_strided_slice %0 {offsets = [0, 1], sizes = [128, 1], strides = [1, 1]} : vector<128x4xf32> to vector<128x1xf32>
    %17 = vector.broadcast %16 : vector<128x1xf32> to vector<128x128xf32>
    %18 = arith.addf %15, %17 : vector<128x128xf32>
    %cst_11 = arith.constant 0.000000e+00 : f32
    %19 = vector.broadcast %cst_11 : f32 to vector<128x128xf32>
    %20 = arith.cmpf ogt, %18, %19 : vector<128x128xf32>
    %cst_12 = arith.constant 0.00999999977 : f32
    %21 = vector.broadcast %cst_12 : f32 to vector<128x128xf32>
    %22 = arith.mulf %21, %18 : vector<128x128xf32>
    %23 = arith.select %20, %18, %22 : vector<128x128xi1>, vector<128x128xf32>
    %c1 = arith.constant 1 : index
    %c0_13 = arith.constant 0 : index
    %c0_14 = arith.constant 0 : index
    %24 = vector.load %arg3[%c1, %c0_13, %c0_14] : memref<2x128x128xbf16, #tpu.memory_space<vmem>>, vector<1x128x128xbf16>
    %25 = vector.shape_cast %24 : vector<1x128x128xbf16> to vector<128x128xbf16>
    %26 = arith.truncf %23 : vector<128x128xf32> to vector<128x128xbf16>
    %cst_15 = arith.constant dense<0.000000e+00> : vector<128x128xf32>
    %27 = tpu.matmul %25, %26, %cst_15 {dimension_numbers = #tpu.dot_dimension_numbers<[1], [0], [0], [1], [0, 0, 1, 1], [], []>} : vector<128x128xbf16>, vector<128x128xbf16>, vector<128x128xf32> -> vector<128x128xf32>
    %28 = vector.extract_strided_slice %0 {offsets = [0, 2], sizes = [128, 1], strides = [1, 1]} : vector<128x4xf32> to vector<128x1xf32>
    %29 = vector.broadcast %28 : vector<128x1xf32> to vector<128x128xf32>
    %30 = arith.addf %27, %29 : vector<128x128xf32>
    %cst_16 = arith.constant 0.000000e+00 : f32
    %31 = vector.broadcast %cst_16 : f32 to vector<128x128xf32>
    %32 = arith.cmpf ogt, %30, %31 : vector<128x128xf32>
    %cst_17 = arith.constant 0.00999999977 : f32
    %33 = vector.broadcast %cst_17 : f32 to vector<128x128xf32>
    %34 = arith.mulf %33, %30 : vector<128x128xf32>
    %35 = arith.select %32, %30, %34 : vector<128x128xi1>, vector<128x128xf32>
    %c0_18 = arith.constant 0 : index
    %c0_19 = arith.constant 0 : index
    %36 = vector.load %arg4[%c0_18, %c0_19] : memref<1x128xbf16, #tpu.memory_space<vmem>>, vector<1x128xbf16>
    %37 = arith.truncf %35 : vector<128x128xf32> to vector<128x128xbf16>
    %cst_20 = arith.constant dense<0.000000e+00> : vector<1x128xf32>
    %38 = tpu.matmul %36, %37, %cst_20 {dimension_numbers = #tpu.dot_dimension_numbers<[1], [0], [0], [1], [0, 0, 1, 1], [], []>} : vector<1x128xbf16>, vector<128x128xbf16>, vector<1x128xf32> -> vector<1x128xf32>
    %39 = vector.extract_strided_slice %0 {offsets = [0, 3], sizes = [1, 1], strides = [1, 1]} : vector<128x4xf32> to vector<1x1xf32>
    %40 = vector.broadcast %39 : vector<1x1xf32> to vector<1x128xf32>
    %41 = arith.addf %38, %40 : vector<1x128xf32>
    %c0_21 = arith.constant 0 : index
    %c0_22 = arith.constant 0 : index
    %42 = vector.load %arg6[%c0_21, %c0_22] : memref<1x128xf32, #tpu.memory_space<vmem>>, vector<1x128xf32>
    tpu.vector_store %arg6[%c0_21, %c0_22], %41 {strides = array<i32>} : memref<1x128xf32, #tpu.memory_space<vmem>>, vector<1x128xf32>,
    return
  }
  func.func @transform_0(%arg0: i32) -> (i32, i32) {
    %c0_i32 = arith.constant 0 : i32
    %c0_i32_0 = arith.constant 0 : i32
    return %c0_i32, %arg0 : i32, i32
  }
  func.func @transform_1(%arg0: i32) -> (i32, i32) {
    %c0_i32 = arith.constant 0 : i32
    %c0_i32_0 = arith.constant 0 : i32
    %c0_i32_1 = arith.constant 0 : i32
    return %c0_i32, %c0_i32_0 : i32, i32
  }
  func.func @transform_2(%arg0: i32) -> (i32, i32, i32) {
    %c0_i32 = arith.constant 0 : i32
    %c0_i32_0 = arith.constant 0 : i32
    %c0_i32_1 = arith.constant 0 : i32
    %c0_i32_2 = arith.constant 0 : i32
    return %c0_i32, %c0_i32_0, %c0_i32_1 : i32, i32, i32
  }
  func.func @transform_3(%arg0: i32) -> (i32, i32) {
    %c0_i32 = arith.constant 0 : i32
    %c0_i32_0 = arith.constant 0 : i32
    %c0_i32_1 = arith.constant 0 : i32
    return %c0_i32, %c0_i32_0 : i32, i32
  }
  func.func @transform_4(%arg0: i32) -> (i32, i32) {
    %c0_i32 = arith.constant 0 : i32
    %c0_i32_0 = arith.constant 0 : i32
    %c0_i32_1 = arith.constant 0 : i32
    return %c0_i32, %c0_i32_0 : i32, i32
  }
  func.func @transform_5(%arg0: i32) -> (i32, i32) {
    %c0_i32 = arith.constant 0 : i32
    %c0_i32_0 = arith.constant 0 : i32
    return %c0_i32, %arg0 : i32, i32
  }
}

</mosaic_0001>

<bundles_post_ra>
// kernel: tpu_custom_call.1
= control target key start
LH: loop header
LB: loop body
LE: loop exit
PB: predicated region body
PF: predicated region fallthrough
CT: control target
= control target key end

     0   :  { %10 = vsyncpa [#allocation4], 0  ;;  %s2030_s0 = inlined_call_operand.vmem [shape: bf16[32,256], index: 0, kind: input, shape index: {}]   ;;  %s2031_s1 = inlined_call_operand.vmem [shape: bf16[128,32], index: 1, kind: input, shape index: {}]   ;;  %s2032_s2 = inlined_call_operand.vmem [shape: bf16[2,128,128], index: 2, kind: input, shape index: {}]   ;;  %s2033_s3 = inlined_call_operand.vmem [shape: bf16[1,128], index: 3, kind: input, shape index: {}]   ;;  %s2034_s4 = inlined_call_operand.vmem [shape: f32[128,4], index: 4, kind: input, shape index: {}]   ;;  %s2035_s5 = inlined_call_operand.hbm [shape: f32[1,256], index: 5, kind: output, shape index: {}]  }
   0x1   :  { %12 = vsyncpa [#allocation4 + $0x1], 0  ;;  %s1699_s18 = smov 0   ;;  %s1701_s19 = smov 0  }
   0x2   :  { %s1703_s20 = smov 0   ;;  %s1705_s21 = smov 0  }
   0x3 LB: > { %s1304_s22 = sadd.s32 4294967295, %s1660_s21   ;;  %s1305_s23 = sadd.s32 4294967294, %s1660_s21   ;;  %s1660_s21 = sphi %s1705_s21, %s2041_s21   ;;  %s1656_s20 = sphi %s1703_s20, %s2040_s20   ;;  %s1652_s19 = sphi %s1701_s19, %s2039_s19   ;;  %s1648_s18 = sphi %s1699_s18, %s2038_s18  }
   0x4   : > { %s1722_s24 = sadd.s32 1, %s1660_s21   ;;  %s25_s25 = sadd.s32 1, %s1656_s20 }
   0x5   : > { %s22_s26 = ssub.s32 %s1660_s21, %s1722_s24  ;;  %p32_p0 = scmp.ne.s32.totalorder %s1656_s20, %s1652_s19 }
   0x6   : > { %p23_p1 = scmp.eq.s32.totalorder %s22_s26, 0  ;;  %p33_p2 = scmp.eq.s32.totalorder %s1660_s21, 0 }
   0x7   : > { %p146_p3 = scmp.eq.s32.totalorder %s1304_s22, 1  ;;  %p151_p4 = scmp.ne.s32.totalorder %s1652_s19, %s1648_s18 }
   0x8   : > { %s1735_s27 = scalar_select %p23_p1, %s1656_s20, %s25_s25  }
   0x9   : > { %p34_p5 = por %p33_p2, %p32_p0  ;;  %p1737_p6 = por %p146_p3, %p32_p0 }
   0xa   : > { %p152_p7 = scmp.eq.s32.totalorder %s1305_s23, 1  ;;  %p1307_p9 = scmp.ge.s32.totalorder %s1660_s21, 2 }
   0xc   : > { %p1741_p8 = por %p152_p7, %p151_p4  ;;  %180 = sbr.rel (%p1307_p9) target bundleno = 26 (0x1a), region = 32 }
  0x13   : > { %183 = sbr.rel (!%p34_p5) target bundleno = 26 (0x1a), region = 36  ;;  %s185_s30 = sand.u32 (%p34_p5), 1, %s1656_s20  }
  0x14   : > { %s1309_s6 = sshll.u32 (%p34_p5), %s1660_s21, 2  ;;  %s1308_s7 = sshll.u32 (%p34_p5), %s185_s30, 4 }
  0x15   : > { %s189_s10 = scalar_lea.vmem (%p34_p5), %s2030_s0, %s1309_s6  ;;  %s187_s11 = scalar_lea.vmem (%p34_p5), [#allocation2], %s1308_s7 }
  0x16   : > { %v205_v0 = vld [vmem:[%s189_s10] sm:$0xf] (%p34_p5)  ;;  %v207_v1 = vld [vmem:[%s189_s10 + $0x8] sm:$0xf] (%p34_p5)  ;;  %v209_v2 = vld [vmem:[%s189_s10 + $0x10] sm:$0xf] (%p34_p5) }
  0x17   : > { %206 = vst [vmem:[%s187_s11] sm:$0xf] (%p34_p5), %v205_v0  ;;  %208 = vst [vmem:[%s187_s11 + $0x4] sm:$0xf] (%p34_p5), %v207_v1  ;;  %v211_v3 = vld [vmem:[%s189_s10 + $0x18] sm:$0xf] (%p34_p5) }
  0x18   : > { %210 = vst [vmem:[%s187_s11 + $0x8] sm:$0xf] (%p34_p5), %v209_v2  ;;  %212 = vst [vmem:[%s187_s11 + $0xc] sm:$0xf] (%p34_p5), %v211_v3 }
  0x1a PF: > { %p1310_p10 = scmp.ge.s32.totalorder %s1660_s21, 1  ;;  %p242_p11 = scmp.lt.s32.totalorder %s1660_s21, 3 }
  0x1c   : > { %p243_p12 = pnand %p1310_p10, %p242_p11 }
  0x1d   : > { %s1756_s12 = sand.u32 (!%p243_p12), 1, %s1652_s19   ;;  %v1574_v4 = vld [vmem:[%s2031_s1] sm:$0xff] (!%p243_p12)   ;;  %vm444_vm0 = vcmask (!%p243_p12), 261120   ;;  %v1662_v7 = vmov (!%p243_p12), 0   ;;  %v1575_v8 = vld [vmem:[%s2031_s1 + $0x8] sm:$0xff] (!%p243_p12)   ;;  %v1576_v9 = vld [vmem:[%s2031_s1 + $0x10] sm:$0xff] (!%p243_p12)  }
  0x1e   : > { %246 = sbr.rel (%p243_p12) target bundleno = 1030 (0x406), region = 77  ;;  %s1311_s15 = sshll.u32 (!%p243_p12), %s1756_s12, 4  ;;  %1420 = vmatprep.mubr.msk.bf16.mxu0 (!%p243_p12), %vm444_vm0, %v1574_v4  ;;  %1565 = vset.pattern.permute.xlu0 (!%p243_p12), %v1662_v7  ;;  %v1772_v10 = vld [vmem:[%s2034_s4] sm:$0xff] (!%p243_p12)  ;;  %v1777_v11 = vld [vmem:[%s2034_s4 + $0x10] sm:$0xff] (!%p243_p12)  ;;  %v1784_v12 = vld [vmem:[%s2034_s4 + $0x8] sm:$0xff] (!%p243_p12)  ;;  %v1663_v32 = vmov (!%p243_p12), 1  }
  0x1f   : > { %s251_s16 = scalar_lea.vmem (!%p243_p12), [#allocation2], %s1311_s15  ;;  %1566 = vset.pattern.permute.xlu1 (!%p243_p12), %v1662_v7  ;;  %314 = vperm.xlu0 (!%p243_p12), %1565, %v1772_v10   ;;  %v1789_v13 = vld [vmem:[%s2034_s4 + $0x18] sm:$0xff] (!%p243_p12)  ;;  %v1801_v15 = vld [vmem:[%s2034_s4 + $0x20] sm:$0xff] (!%p243_p12)  ;;  %v1806_v16 = vld [vmem:[%s2034_s4 + $0x28] sm:$0xff] (!%p243_p12)  ;;  %s1362_s6 = sshll.u32 (!%p243_p12), %s1304_s22, 4 }
  0x20   : > { %v1572_v5 = vld [vmem:[%s251_s16] sm:$0xff] (!%p243_p12)   ;;  %v1573_v6 = vld [vmem:[%s251_s16 + $0x8] sm:$0xff] (!%p243_p12)   ;;  %324 = vperm.xlu1 (!%p243_p12), %1566, %v1777_v11   ;;  %s274_s7 = scalar_lea.vmem (!%p243_p12), [#allocation3], %s1756_s12  ;;  %s1986_s11 = scalar_lea.hbm (!%p243_p12), %s2035_s5, %s1362_s6 }
  0x21   : > { %1416 = vmatprep.subr.bf16.mxu0 (!%p243_p12), %v1572_v5  ;;  %v1577_v14 = vld [vmem:[%s2031_s1 + $0x18] sm:$0xff] (!%p243_p12)   ;;  %v1578_v17 = vld [vmem:[%s2031_s1 + $0x20] sm:$0xff] (!%p243_p12)   ;;  %v1814_v18 = vld [vmem:[%s2034_s4 + $0x30] sm:$0xff] (!%p243_p12)  ;;  %s1244_s8 = sshll.u32 (!%p243_p12), %s274_s7, 4  ;;  %s1232_s13 = scalar_lea.sflag (!%p243_p12), [#allocation4], %s1756_s12  ;;  %s1988_s8 = int_to_ptr.vmem [resolvable:$true] %s1244_s8 }
  0x22   : > { %1417 = vmatpush3.bf16.msra.mxu0 (!%p243_p12), %v1572_v5  ;;  %v1819_v19 = vld [vmem:[%s2034_s4 + $0x38] sm:$0xff] (!%p243_p12)  ;;  %v1828_v20 = vld [vmem:[%s2034_s4 + $0x40] sm:$0xff] (!%p243_p12)  ;;  %v1833_v21 = vld [vmem:[%s2034_s4 + $0x48] sm:$0xff] (!%p243_p12)  ;;  %s1598_s22 = scalar_lea.vmem (!%p243_p12), %s1988_s8, 16  ;;  %s1668_s14 = smov (!%p243_p12), [#allocation3]  }
  0x23   : > { %1418 = vmatprep.subr.bf16.mxu0 (!%p243_p12), %v1573_v6  ;;  %319 = vperm.xlu0 (!%p243_p12), %1565, %v1784_v12   ;;  %v1579_v22 = vld [vmem:[%s2031_s1 + $0x28] sm:$0xff] (!%p243_p12)   ;;  %v1580_v23 = vld [vmem:[%s2031_s1 + $0x30] sm:$0xff] (!%p243_p12)   ;;  %v1853_v25 = vld [vmem:[%s2034_s4 + $0x58] sm:$0xff] (!%p243_p12)  ;;  %p1599_p13 = scmp.ne.s32.totalorder (!%p243_p12), %s1988_s8, %s1598_s22  ;;  %s1602_s15 = sshll.u32 (!%p243_p12), %s1668_s14, 4  ;;  %s1603_s15 = int_to_ptr.vmem [resolvable:$false] %s1602_s15 }
  0x24   : > { %329 = vperm.xlu1 (!%p243_p12), %1566, %v1789_v13   ;;  %v1848_v24 = vld [vmem:[%s2034_s4 + $0x50] sm:$0xff] (!%p243_p12)  ;;  %v1862_v26 = vld [vmem:[%s2034_s4 + $0x60] sm:$0xff] (!%p243_p12)  ;;  %v1867_v27 = vld [vmem:[%s2034_s4 + $0x68] sm:$0xff] (!%p243_p12)  ;;  %s1604_s16 = scalar_lea.vmem (!%p243_p12), %s1603_s15, 32  ;;  %p1605_p2 = scmp.lt.s32.totalorder (!%p243_p12), %s1988_s8, %s1603_s15 }
  0x25   : > { %v1581_v28 = vld [vmem:[%s2031_s1 + $0x38] sm:$0xff]   ;;  %v1877_v29 = vld [vmem:[%s2034_s4 + $0x70] sm:$0xff]  ;;  %v1582_v31 = vld [vmem:[%s2032_s2] sm:$0xff]   ;;  %p1600_p0 = pnand %p1599_p13, %p1737_p6  ;;  %p1606_p3 = scmp.lt.s32.totalorder %s1604_s16, %s1598_s22 }
  0x26   : > { %1419 = vmatpush3.bf16.msra.mxu0 %v1573_v6  ;;  %v1882_v30 = vld [vmem:[%s2034_s4 + $0x78] sm:$0xff]  ;;  %1452 = vmatprep.mubr.bf16.mxu1 %v1582_v31 }
  0x27   : > { %334 = vperm.xlu0 %1565, %v1801_v15   ;;  %p1601_p1 = pneg %p1600_p0  ;;  %p1607_p4 = por %p1606_p3, %p1605_p2 }
  0x28   : > { %339 = vperm.xlu1 %1566, %v1806_v16  }
  0x29   : > { %1421 = vmatmul.mubr.msk.bf16.vlgmr.msra.gmra.mrb[0].mxu0 %vm444_vm0, %v1575_v8  ;;  %p1608_p5 = pnand %p1607_p4, %p1601_p1 }
  0x2a   : > { %1424 = vmatprep.mubr.msk.bf16.mxu0 %vm444_vm0, %v1576_v9 }
  0x2b   : > { %344 = vperm.xlu0 %1565, %v1814_v18  }
  0x2c   : > { %349 = vperm.xlu1 %1566, %v1819_v19  }
  0x2f   : > { %354 = vperm.xlu0 %1565, %v1828_v20  }
  0x30   : > { %359 = vperm.xlu1 %1566, %v1833_v21  }
  0x31   : > { %1425 = vmatmul.mubr.msk.bf16.gmra.mrb[4].mxu0 %vm444_vm0, %v1577_v14 }
  0x32   : > { %1428 = vmatprep.mubr.msk.bf16.mxu0 %vm444_vm0, %v1578_v17 }
  0x33   : > { %364 = vperm.xlu0 %1565, %v1848_v24  }
  0x34   : > { %369 = vperm.xlu1 %1566, %v1853_v25  }
  0x37   : > { %374 = vperm.xlu0 %1565, %v1862_v26  }
  0x38   : > { %379 = vperm.xlu1 %1566, %v1867_v27  }
  0x39   : > { %1429 = vmatmul.mubr.msk.bf16.gmra.mrb[8].mxu0 %vm444_vm0, %v1579_v22 }
  0x3a   : > { %1432 = vmatprep.mubr.msk.bf16.mxu0 %vm444_vm0, %v1580_v23 }
  0x3b   : > { %384 = vperm.xlu0 %1565, %v1877_v29  }
  0x3c   : > { %389 = vperm.xlu1 %1566, %v1882_v30  }
  0x3f   : > { %1567 = vset.pattern.permute.xlu0 %v1663_v32 }
  0x40   : > { %1568 = vset.pattern.permute.xlu1 %v1663_v32  ;;  %639 = vperm.xlu0 %1567, %v1772_v10  }
  0x41   : > { %1433 = vmatmul.mubr.msk.bf16.gmra.mrb[12].mxu0 %vm444_vm0, %v1581_v28  ;;  %643 = vperm.xlu1 %1568, %v1784_v12  }
  0x44   : > { %651 = vperm.xlu0 %1567, %v1789_v13  }
  0x45   : > { %647 = vperm.xlu1 %1568, %v1777_v11  }
  0x48   : > { %659 = vperm.xlu0 %1567, %v1806_v16  }
  0x49   : > { %655 = vperm.xlu1 %1568, %v1801_v15  }
  0x4c   : > { %667 = vperm.xlu0 %1567, %v1819_v19  }
  0x4d   : > { %663 = vperm.xlu1 %1568, %v1814_v18  }
  0x50   : > { %675 = vperm.xlu0 %1567, %v1833_v21  }
  0x51   : > { %671 = vperm.xlu1 %1568, %v1828_v20  }
  0x54   : > { %683 = vperm.xlu0 %1567, %v1853_v25  }
  0x55   : > { %679 = vperm.xlu1 %1568, %v1848_v24  }
  0x58   : > { %691 = vperm.xlu0 %1567, %v1867_v27  }
  0x59   : > { %687 = vperm.xlu1 %1568, %v1862_v26  }
  0x5c   : > { %699 = vperm.xlu0 %1567, %v1882_v30  }
  0x5d   : > { %695 = vperm.xlu1 %1568, %v1877_v29  }
  0x9e   : > { %v315_v33 = vpop.permute.xlu0 %314 }
  0x9f   : > { %v325_v34 = vpop.permute.xlu1 %324 }
  0xa2   : > { %v320_v35 = vpop.permute.xlu0 %319 }
  0xa3   : > { %v330_v36 = vpop.permute.xlu1 %329 }
  0xa6   : > { %v335_v37 = vpop.permute.xlu0 %334 }
  0xa7   : > { %v340_v38 = vpop.permute.xlu1 %339 }
  0xaa   : > { %v345_v39 = vpop.permute.xlu0 %344 }
  0xab   : > { %v350_v43 = vpop.permute.xlu1 %349 }
  0xae   : > { %v355_v52 = vpop.permute.xlu0 %354 }
  0xaf   : > { %v360_v56 = vpop.permute.xlu1 %359 }
  0xb2   : > { %v365_v5 = vpop.permute.xlu0 %364 }
  0xb3   : > { %v370_v9 = vpop.permute.xlu1 %369 }
  0xfc   : > { %v1422_v40 = vpop.f32.mrb[0].mxu0 }
  0xfd   : > { %v512_v41 = vadd.f32 %v1422_v40, %v325_v34  ;;  %v503_v42 = vpop.f32.mrb[1].mxu0 }
  0xfe   : > { %v504_v44 = vadd.f32 %v503_v42, %v315_v33  ;;  %v1423_v45 = vpop.f32.mrb[2].mxu0  ;;  %v380_v42 = vpop.permute.xlu1 %379 }
  0xff   : > { %v584_v46 = vmul.f32 0.01, %v512_v41  ;;  %v515_v47 = vadd.f32 %v1423_v45, %v330_v36  ;;  %v506_v48 = vpop.f32.mrb[3].mxu0  ;;  %vm568_vm1 = vcmp.gt.f32.partialorder %v512_v41, 0.0  ;;  %v375_v36 = vpop.permute.xlu0 %374 }
 0x100   : > { %v582_v49 = vmul.f32 0.01, %v504_v44  ;;  %v507_v50 = vadd.f32 %v506_v48, %v320_v35  ;;  %vm566_vm3 = vcmp.gt.f32.partialorder %v504_v44, 0.0 }
 0x101   : > { %vm569_vm2 = vcmp.gt.f32.partialorder %v515_v47, 0.0  ;;  %v585_v51 = vmul.f32 0.01, %v515_v47  ;;  %v600_v54 = vsel %vm568_vm1, %v512_v41, %v584_v46 }
 0x102   : > { %v583_v53 = vmul.f32 0.01, %v507_v50  ;;  %vm567_vm4 = vcmp.gt.f32.partialorder %v507_v50, 0.0  ;;  %v598_v58 = vsel %vm566_vm3, %v504_v44, %v582_v49 }
 0x103   : > { %v601_v55 = vsel %vm569_vm2, %v515_v47, %v585_v51  ;;  %v385_v49 = vpop.permute.xlu0 %384 }
 0x104   : > { %v1426_v57 = vpop.f32.mrb[4].mxu0  ;;  %v599_v59 = vsel %vm567_vm4, %v507_v50, %v583_v53  ;;  %v631_v60 = vpack.c.bf16 %v601_v55, %v600_v54 }
 0x105   : > { %v528_v61 = vadd.f32 %v1426_v57, %v345_v39  ;;  %v519_v62 = vpop.f32.mrb[5].mxu0  ;;  %v630_v63 = vpack.c.bf16 %v599_v59, %v598_v58  ;;  %v390_v58 = vpop.permute.xlu1 %389 }
 0x106   : > { %v520_v0 = vadd.f32 %v519_v62, %v335_v37  ;;  %v1427_v1 = vpop.f32.mrb[6].mxu0 }
 0x107   : > { %v588_v2 = vmul.f32 0.01, %v528_v61  ;;  %v531_v3 = vadd.f32 %v1427_v1, %v350_v43  ;;  %v522_v4 = vpop.f32.mrb[7].mxu0  ;;  %1436 = vmatprep.subr.bf16.mxu1 %v630_v63  ;;  %vm572_vm5 = vcmp.gt.f32.partialorder %v528_v61, 0.0 }
 0x108   : > { %v586_v6 = vmul.f32 0.01, %v520_v0  ;;  %v523_v7 = vadd.f32 %v522_v4, %v340_v38  ;;  %1437 = vmatpush3.bf16.msra.mxu1 %v630_v63  ;;  %vm570_vm6 = vcmp.gt.f32.partialorder %v520_v0, 0.0 }
 0x109   : > { %vm573_vm7 = vcmp.gt.f32.partialorder %v531_v3, 0.0  ;;  %v589_v8 = vmul.f32 0.01, %v531_v3  ;;  %1438 = vmatprep.subr.bf16.mxu1 %v631_v60  ;;  %v604_v17 = vsel %vm572_vm5, %v528_v61, %v588_v2 }
 0x10a   : > { %vm571_vm8 = vcmp.gt.f32.partialorder %v523_v7, 0.0  ;;  %v587_v14 = vmul.f32 0.01, %v523_v7  ;;  %v602_v28 = vsel %vm570_vm6, %v520_v0, %v586_v6 }
 0x10b   : > { %v605_v22 = vsel %vm573_vm7, %v531_v3, %v589_v8 }
 0x10c   : > { %v1430_v23 = vpop.f32.mrb[8].mxu0  ;;  %1439 = vmatpush3.bf16.msra.mxu1 %v631_v60  ;;  %v603_v31 = vsel %vm571_vm8, %v523_v7, %v587_v14  ;;  %v633_v32 = vpack.c.bf16 %v605_v22, %v604_v17  ;;  %v1584_v14 = vld [vmem:[%s2032_s2 + $0x10] sm:$0xff]   ;;  %v1585_v17 = vld [vmem:[%s2032_s2 + $0x18] sm:$0xff]   ;;  %v1586_v22 = vld [vmem:[%s2032_s2 + $0x20] sm:$0xff]  }
 0x10d   : > { %v544_v33 = vadd.f32 %v1430_v23, %v365_v5  ;;  %v535_v34 = vpop.f32.mrb[9].mxu0  ;;  %v632_v35 = vpack.c.bf16 %v603_v31, %v602_v28  ;;  %v1587_v23 = vld [vmem:[%s2032_s2 + $0x28] sm:$0xff]   ;;  %v1588_v28 = vld [vmem:[%s2032_s2 + $0x30] sm:$0xff]   ;;  %v1589_v31 = vld [vmem:[%s2032_s2 + $0x38] sm:$0xff]  }
 0x10e   : > { %v536_v37 = vadd.f32 %v535_v34, %v355_v52  ;;  %v1431_v38 = vpop.f32.mrb[10].mxu0 }
 0x10f   : > { %v592_v39 = vmul.f32 0.01, %v544_v33  ;;  %v547_v40 = vadd.f32 %v1431_v38, %v370_v9  ;;  %v538_v41 = vpop.f32.mrb[11].mxu0  ;;  %1440 = vmatprep.subr.bf16.mxu1 %v632_v35  ;;  %vm576_vm9 = vcmp.gt.f32.partialorder %v544_v33, 0.0  ;;  %v1583_v9 = vld [vmem:[%s2032_s2 + $0x8] sm:$0xff]  }
 0x110   : > { %v590_v43 = vmul.f32 0.01, %v536_v37  ;;  %v539_v44 = vadd.f32 %v538_v41, %v360_v56  ;;  %1441 = vmatpush3.bf16.msra.mxu1 %v632_v35  ;;  %vm574_vm10 = vcmp.gt.f32.partialorder %v536_v37, 0.0 }
 0x111   : > { %vm577_vm11 = vcmp.gt.f32.partialorder %v547_v40, 0.0  ;;  %v593_v45 = vmul.f32 0.01, %v547_v40  ;;  %1442 = vmatprep.subr.bf16.mxu1 %v633_v32  ;;  %v608_v47 = vsel %vm576_vm9, %v544_v33, %v592_v39  ;;  %v1664_v33 = vmov 2  }
 0x112   : > { %vm575_vm12 = vcmp.gt.f32.partialorder %v539_v44, 0.0  ;;  %v591_v46 = vmul.f32 0.01, %v539_v44  ;;  %v606_v51 = vsel %vm574_vm10, %v536_v37, %v590_v43  ;;  %1569 = vset.pattern.permute.xlu1 %v1664_v33  ;;  %1570 = vset.pattern.permute.xlu0 %v1664_v33 }
 0x113   : > { %v609_v48 = vsel %vm577_vm11, %v547_v40, %v593_v45  ;;  %921 = vperm.xlu1 %1569, %v1772_v10   ;;  %925 = vperm.xlu0 %1570, %v1784_v12   ;;  %v640_v12 = vpop.permute.xlu0 %639 }
 0x114   : > { %v1434_v50 = vpop.f32.mrb[12].mxu0  ;;  %1443 = vmatpush3.bf16.msra.mxu1 %v633_v32  ;;  %v607_v52 = vsel %vm575_vm12, %v539_v44, %v591_v46  ;;  %v635_v53 = vpack.c.bf16 %v609_v48, %v608_v47  ;;  %v1590_v32 = vld [vmem:[%s2032_s2 + $0x40] sm:$0xff]  }
 0x115   : > { %v560_v54 = vadd.f32 %v1434_v50, %v385_v49  ;;  %v551_v55 = vpop.f32.mrb[13].mxu0  ;;  %v634_v57 = vpack.c.bf16 %v607_v52, %v606_v51  ;;  %1484 = vmatprep.mubr.bf16.mxu0 %v1590_v32 }
 0x116   : > { %v552_v56 = vadd.f32 %v551_v55, %v375_v36  ;;  %v1435_v59 = vpop.f32.mrb[14].mxu0 }
 0x117   : > { %v596_v60 = vmul.f32 0.01, %v560_v54  ;;  %v563_v61 = vadd.f32 %v1435_v59, %v390_v58  ;;  %v554_v62 = vpop.f32.mrb[15].mxu0  ;;  %1444 = vmatprep.subr.bf16.mxu1 %v634_v57  ;;  %vm580_vm13 = vcmp.gt.f32.partialorder %v560_v54, 0.0  ;;  %929 = vperm.xlu1 %1569, %v1777_v11   ;;  %v644_v11 = vpop.permute.xlu1 %643 }
 0x118   : > { %v594_v63 = vmul.f32 0.01, %v552_v56  ;;  %v555_v0 = vadd.f32 %v554_v62, %v380_v42  ;;  %1445 = vmatpush3.bf16.msra.mxu1 %v634_v57  ;;  %vm578_vm14 = vcmp.gt.f32.partialorder %v552_v56, 0.0  ;;  %937 = vperm.xlu0 %1570, %v1801_v15   ;;  %v652_v15 = vpop.permute.xlu0 %651 }
 0x119   : > { %vm581_vm15 = vcmp.gt.f32.partialorder %v563_v61, 0.0  ;;  %v597_v1 = vmul.f32 0.01, %v563_v61  ;;  %1446 = vmatprep.subr.bf16.mxu1 %v635_v53  ;;  %v612_v3 = vsel %vm580_vm13, %v560_v54, %v596_v60 }
 0x11a   : > { %vm579_vm0 = vcmp.gt.f32.partialorder %v555_v0, 0.0  ;;  %v595_v2 = vmul.f32 0.01, %v555_v0  ;;  %v610_v5 = vsel %vm578_vm14, %v552_v56, %v594_v63 }
 0x11b   : > { %v613_v4 = vsel %vm581_vm15, %v563_v61, %v597_v1  ;;  %933 = vperm.xlu1 %1569, %v1789_v13   ;;  %v648_v13 = vpop.permute.xlu1 %647 }
 0x11c   : > { %1447 = vmatpush3.bf16.msra.mxu1 %v635_v53  ;;  %v611_v6 = vsel %vm579_vm0, %v555_v0, %v595_v2  ;;  %v637_v7 = vpack.c.bf16 %v613_v4, %v612_v3  ;;  %945 = vperm.xlu0 %1570, %v1814_v18   ;;  %v660_v18 = vpop.permute.xlu0 %659 }
 0x11d   : > { %v636_v8 = vpack.c.bf16 %v611_v6, %v610_v5 }
 0x11f   : > { %1448 = vmatprep.subr.bf16.mxu1 %v636_v8  ;;  %941 = vperm.xlu1 %1569, %v1806_v16   ;;  %v656_v16 = vpop.permute.xlu1 %655 }
 0x120   : > { %1449 = vmatpush3.bf16.msra.mxu1 %v636_v8  ;;  %953 = vperm.xlu0 %1570, %v1828_v20   ;;  %v668_v34 = vpop.permute.xlu0 %667 }
 0x121   : > { %1450 = vmatprep.subr.bf16.mxu1 %v637_v7 }
 0x123   : > { %949 = vperm.xlu1 %1569, %v1819_v19   ;;  %v664_v19 = vpop.permute.xlu1 %663 }
 0x124   : > { %1451 = vmatpush3.bf16.msra.mxu1 %v637_v7  ;;  %961 = vperm.xlu0 %1570, %v1848_v24   ;;  %v676_v42 = vpop.permute.xlu0 %675 }
 0x127   : > { %1453 = vmatmul.mubr.bf16.vlgmr.msra.gmra.mrb[0].mxu1 %v1583_v9  ;;  %957 = vperm.xlu1 %1569, %v1833_v21   ;;  %v672_v38 = vpop.permute.xlu1 %671 }
 0x128   : > { %1456 = vmatprep.mubr.bf16.mxu1 %v1584_v14  ;;  %969 = vperm.xlu0 %1570, %v1862_v26   ;;  %v684_v59 = vpop.permute.xlu0 %683 }
 0x12b   : > { %965 = vperm.xlu1 %1569, %v1853_v25   ;;  %v680_v55 = vpop.permute.xlu1 %679 }
 0x12c   : > { %977 = vperm.xlu0 %1570, %v1877_v29  }
 0x12f   : > { %1457 = vmatmul.mubr.bf16.gmra.mrb[4].mxu1 %v1585_v17  ;;  %973 = vperm.xlu1 %1569, %v1867_v27   ;;  %v688_v6 = vpop.permute.xlu1 %687 }
 0x130   : > { %1460 = vmatprep.mubr.bf16.mxu1 %v1586_v22  ;;  %v692_v22 = vpop.permute.xlu0 %691 }
 0x133   : > { %981 = vperm.xlu1 %1569, %v1882_v30  }
 0x137   : > { %1461 = vmatmul.mubr.bf16.gmra.mrb[8].mxu1 %v1587_v23 }
 0x138   : > { %1464 = vmatprep.mubr.bf16.mxu1 %v1588_v28 }
 0x13f   : > { %1465 = vmatmul.mubr.bf16.gmra.mrb[12].mxu1 %v1589_v31 }
 0x1fa   : > { %v1454_v20 = vpop.f32.mrb[0].mxu1 }
 0x1fb   : > { %v793_v24 = vadd.f32 %v1454_v20, %v648_v13  ;;  %v784_v21 = vpop.f32.mrb[1].mxu1 }
 0x1fc   : > { %v785_v26 = vadd.f32 %v784_v21, %v640_v12  ;;  %v1455_v35 = vpop.f32.mrb[2].mxu1  ;;  %v696_v12 = vpop.permute.xlu1 %695 }
 0x1fd   : > { %v865_v25 = vmul.f32 0.01, %v793_v24  ;;  %v796_v36 = vadd.f32 %v1455_v35, %v652_v15  ;;  %v787_v29 = vpop.f32.mrb[3].mxu1  ;;  %vm849_vm1 = vcmp.gt.f32.partialorder %v793_v24, 0.0  ;;  %v700_v21 = vpop.permute.xlu0 %699 }
 0x1fe   : > { %v863_v27 = vmul.f32 0.01, %v785_v26  ;;  %v788_v37 = vadd.f32 %v787_v29, %v644_v11  ;;  %vm847_vm2 = vcmp.gt.f32.partialorder %v785_v26, 0.0 }
 0x1ff   : > { %vm850_vm3 = vcmp.gt.f32.partialorder %v796_v36, 0.0  ;;  %v866_v30 = vmul.f32 0.01, %v796_v36  ;;  %v881_v40 = vsel %vm849_vm1, %v793_v24, %v865_v25  ;;  %vm1666_vm1 = vmmov 0  }
 0x200   : > { %vm848_vm4 = vcmp.gt.f32.partialorder %v788_v37, 0.0  ;;  %v864_v39 = vmul.f32 0.01, %v788_v37  ;;  %v879_v44 = vsel %vm847_vm2, %v785_v26, %v863_v27 }
 0x201   : > { %v882_v41 = vsel %vm850_vm3, %v796_v36, %v866_v30 }
 0x202   : > { %v1458_v43 = vpop.f32.mrb[4].mxu1  ;;  %v880_v45 = vsel %vm848_vm4, %v788_v37, %v864_v39  ;;  %v913_v46 = vpack.c.bf16 %v882_v41, %v881_v40 }
 0x203   : > { %v809_v47 = vadd.f32 %v1458_v43, %v664_v19  ;;  %v800_v48 = vpop.f32.mrb[5].mxu1  ;;  %v912_v49 = vpack.c.bf16 %v880_v45, %v879_v44  ;;  %v1591_v44 = vld [vmem:[%s2032_s2 + $0x48] sm:$0xff]   ;;  %v1592_v45 = vld [vmem:[%s2032_s2 + $0x50] sm:$0xff]  }
 0x204   : > { %v801_v50 = vadd.f32 %v800_v48, %v656_v16  ;;  %v1459_v51 = vpop.f32.mrb[6].mxu1  ;;  %v1595_v48 = vld [vmem:[%s2032_s2 + $0x68] sm:$0xff]  }
 0x205   : > { %v869_v52 = vmul.f32 0.01, %v809_v47  ;;  %v812_v53 = vadd.f32 %v1459_v51, %v668_v34  ;;  %v803_v54 = vpop.f32.mrb[7].mxu1  ;;  %1468 = vmatprep.subr.bf16.mxu0 %v912_v49  ;;  %vm853_vm5 = vcmp.gt.f32.partialorder %v809_v47, 0.0  ;;  %v1665_v51 = vmov 0.0  }
 0x206   : > { %v867_v57 = vmul.f32 0.01, %v801_v50  ;;  %v804_v58 = vadd.f32 %v803_v54, %v660_v18  ;;  %1469 = vmatpush3.bf16.msra.mxu0 %v912_v49  ;;  %vm851_vm6 = vcmp.gt.f32.partialorder %v801_v50, 0.0  ;;  %v1596_v49 = vld [vmem:[%s2032_s2 + $0x70] sm:$0xff]   ;;  %1500 = vmatprep.subr.bf16.mxu1 %v1665_v51 }
 0x207   : > { %vm854_vm7 = vcmp.gt.f32.partialorder %v812_v53, 0.0  ;;  %v870_v56 = vmul.f32 0.01, %v812_v53  ;;  %1470 = vmatprep.subr.bf16.mxu0 %v913_v46  ;;  %v885_v61 = vsel %vm853_vm5, %v809_v47, %v869_v52  ;;  %v1594_v47 = vld [vmem:[%s2032_s2 + $0x60] sm:$0xff]   ;;  %1516 = vmatprep.mubr.msk.bf16.mxu1 %vm1666_vm1, %v1665_v51  ;;  %v1667_v52 = vmov 3  }
 0x208   : > { %vm852_vm8 = vcmp.gt.f32.partialorder %v804_v58, 0.0  ;;  %v868_v60 = vmul.f32 0.01, %v804_v58  ;;  %v883_v0 = vsel %vm851_vm6, %v801_v50, %v867_v57  ;;  %v1597_v50 = vld [vmem:[%s2032_s2 + $0x78] sm:$0xff]   ;;  %1571 = vset.pattern.permute.xlu0 %v1667_v52 }
 0x209   : > { %v886_v62 = vsel %vm854_vm7, %v812_v53, %v870_v56  ;;  %1187 = vperm.xlu0 %1571, %v1772_v10   ;;  %v922_v53 = vpop.permute.xlu1 %921 }
 0x20a   : > { %v1462_v63 = vpop.f32.mrb[8].mxu1  ;;  %1471 = vmatpush3.bf16.msra.mxu0 %v913_v46  ;;  %v884_v1 = vsel %vm852_vm8, %v804_v58, %v868_v60  ;;  %v915_v2 = vpack.c.bf16 %v886_v62, %v885_v61  ;;  %v1593_v46 = vld [vmem:[%s2032_s2 + $0x58] sm:$0xff]  }
 0x20b   : > { %v825_v3 = vadd.f32 %v1462_v63, %v680_v55  ;;  %v816_v4 = vpop.f32.mrb[9].mxu1  ;;  %v914_v5 = vpack.c.bf16 %v884_v1, %v883_v0  ;;  %v926_v55 = vpop.permute.xlu0 %925 }
 0x20c   : > { %v817_v7 = vadd.f32 %v816_v4, %v672_v38  ;;  %v1463_v8 = vpop.f32.mrb[10].mxu1 }
 0x20d   : > { %v873_v9 = vmul.f32 0.01, %v825_v3  ;;  %v828_v14 = vadd.f32 %v1463_v8, %v684_v59  ;;  %v819_v17 = vpop.f32.mrb[11].mxu1  ;;  %1472 = vmatprep.subr.bf16.mxu0 %v914_v5  ;;  %vm857_vm9 = vcmp.gt.f32.partialorder %v825_v3, 0.0  ;;  %v930_v54 = vpop.permute.xlu1 %929 }
 0x20e   : > { %v871_v23 = vmul.f32 0.01, %v817_v7  ;;  %v820_v28 = vadd.f32 %v819_v17, %v676_v42  ;;  %1473 = vmatpush3.bf16.msra.mxu0 %v914_v5  ;;  %vm855_vm10 = vcmp.gt.f32.partialorder %v817_v7, 0.0 }
 0x20f   : > { %vm858_vm11 = vcmp.gt.f32.partialorder %v828_v14, 0.0  ;;  %v874_v31 = vmul.f32 0.01, %v828_v14  ;;  %1474 = vmatprep.subr.bf16.mxu0 %v915_v2  ;;  %v889_v33 = vsel %vm857_vm9, %v825_v3, %v873_v9  ;;  %v938_v58 = vpop.permute.xlu0 %937 }
 0x210   : > { %vm856_vm12 = vcmp.gt.f32.partialorder %v820_v28, 0.0  ;;  %v872_v32 = vmul.f32 0.01, %v820_v28  ;;  %v887_v15 = vsel %vm855_vm10, %v817_v7, %v871_v23 }
 0x211   : > { %v890_v11 = vsel %vm858_vm11, %v828_v14, %v874_v31  ;;  %v934_v57 = vpop.permute.xlu1 %933 }
 0x212   : > { %v1466_v13 = vpop.f32.mrb[12].mxu1  ;;  %1475 = vmatpush3.bf16.msra.mxu0 %v915_v2  ;;  %v888_v16 = vsel %vm856_vm12, %v820_v28, %v872_v32  ;;  %v917_v18 = vpack.c.bf16 %v890_v11, %v889_v33 }
 0x213   : > { %v841_v19 = vadd.f32 %v1466_v13, %v696_v12  ;;  %v832_v20 = vpop.f32.mrb[13].mxu1  ;;  %v916_v24 = vpack.c.bf16 %v888_v16, %v887_v15  ;;  %v946_v59 = vpop.permute.xlu0 %945 }
 0x214   : > { %v833_v34 = vadd.f32 %v832_v20, %v688_v6  ;;  %v1467_v26 = vpop.f32.mrb[14].mxu1 }
 0x215   : > { %v877_v35 = vmul.f32 0.01, %v841_v19  ;;  %v844_v25 = vadd.f32 %v1467_v26, %v700_v21  ;;  %v835_v36 = vpop.f32.mrb[15].mxu1  ;;  %1476 = vmatprep.subr.bf16.mxu0 %v916_v24  ;;  %vm861_vm13 = vcmp.gt.f32.partialorder %v841_v19, 0.0  ;;  %v942_v56 = vpop.permute.xlu1 %941 }
 0x216   : > { %v875_v29 = vmul.f32 0.01, %v833_v34  ;;  %v836_v27 = vadd.f32 %v835_v36, %v692_v22  ;;  %1477 = vmatpush3.bf16.msra.mxu0 %v916_v24  ;;  %vm859_vm14 = vcmp.gt.f32.partialorder %v833_v34, 0.0 }
 0x217   : > { %vm862_vm15 = vcmp.gt.f32.partialorder %v844_v25, 0.0  ;;  %v878_v37 = vmul.f32 0.01, %v844_v25  ;;  %1478 = vmatprep.subr.bf16.mxu0 %v917_v18  ;;  %v893_v38 = vsel %vm861_vm13, %v841_v19, %v877_v35  ;;  %v954_v7 = vpop.permute.xlu0 %953 }
 0x218   : > { %vm860_vm0 = vcmp.gt.f32.partialorder %v836_v27, 0.0  ;;  %v876_v30 = vmul.f32 0.01, %v836_v27  ;;  %v891_v40 = vsel %vm859_vm14, %v833_v34, %v875_v29 }
 0x219   : > { %v894_v39 = vsel %vm862_vm15, %v844_v25, %v878_v37  ;;  %v950_v63 = vpop.permute.xlu1 %949 }
 0x21a   : > { %1479 = vmatpush3.bf16.msra.mxu0 %v917_v18  ;;  %v892_v41 = vsel %vm860_vm0, %v836_v27, %v876_v30  ;;  %v919_v42 = vpack.c.bf16 %v894_v39, %v893_v38 }
 0x21b   : > { %v918_v43 = vpack.c.bf16 %v892_v41, %v891_v40  ;;  %v962_v19 = vpop.permute.xlu0 %961 }
 0x21d   : > { %1480 = vmatprep.subr.bf16.mxu0 %v918_v43  ;;  %v958_v17 = vpop.permute.xlu1 %957 }
 0x21e   : > { %1481 = vmatpush3.bf16.msra.mxu0 %v918_v43 }
 0x21f   : > { %1482 = vmatprep.subr.bf16.mxu0 %v919_v42  ;;  %v970_v40 = vpop.permute.xlu0 %969 }
 0x221   : > { %v966_v34 = vpop.permute.xlu1 %965 }
 0x222   : > { %1483 = vmatpush3.bf16.msra.mxu0 %v919_v42 }
 0x225   : > { %1485 = vmatmul.mubr.bf16.vlgmr.msra.gmra.mrb[16].mxu0 %v1591_v44 }
 0x226   : > { %1488 = vmatprep.mubr.bf16.mxu0 %v1592_v45 }
 0x22d   : > { %1489 = vmatmul.mubr.bf16.gmra.mrb[20].mxu0 %v1593_v46  ;;  %v974_v46 = vpop.permute.xlu1 %973 }
 0x22e   : > { %1492 = vmatprep.mubr.bf16.mxu0 %v1594_v47 }
 0x235   : > { %1493 = vmatmul.mubr.bf16.gmra.mrb[24].mxu0 %v1595_v48 }
 0x236   : > { %1496 = vmatprep.mubr.bf16.mxu0 %v1596_v49 }
 0x23d   : > { %1497 = vmatmul.mubr.bf16.gmra.mrb[28].mxu0 %v1597_v50 }
 0x2f8   : > { %v1486_v60 = vpop.f32.mrb[16].mxu0 }
 0x2f9   : > { %v1075_v61 = vadd.f32 %v1486_v60, %v930_v54  ;;  %v1066_v62 = vpop.f32.mrb[17].mxu0  ;;  %v978_v54 = vpop.permute.xlu0 %977 }
 0x2fa   : > { %v1067_v0 = vadd.f32 %v1066_v62, %v922_v53  ;;  %v1487_v1 = vpop.f32.mrb[18].mxu0  ;;  %v982_v62 = vpop.permute.xlu1 %981 }
 0x2fb   : > { %v1147_v2 = vmul.f32 0.01, %v1075_v61  ;;  %v1078_v3 = vadd.f32 %v1487_v1, %v934_v57  ;;  %v1069_v4 = vpop.f32.mrb[19].mxu0  ;;  %vm1131_vm2 = vcmp.gt.f32.partialorder %v1075_v61, 0.0 }
 0x2fc   : > { %v1145_v5 = vmul.f32 0.01, %v1067_v0  ;;  %v1070_v6 = vadd.f32 %v1069_v4, %v926_v55  ;;  %vm1129_vm3 = vcmp.gt.f32.partialorder %v1067_v0, 0.0 }
 0x2fd   : > { %vm1132_vm4 = vcmp.gt.f32.partialorder %v1078_v3, 0.0  ;;  %v1148_v10 = vmul.f32 0.01, %v1078_v3  ;;  %v1163_v9 = vsel %vm1131_vm2, %v1075_v61, %v1147_v2 }
 0x2fe   : > { %vm1130_vm5 = vcmp.gt.f32.partialorder %v1070_v6, 0.0  ;;  %v1146_v8 = vmul.f32 0.01, %v1070_v6  ;;  %v1161_v22 = vsel %vm1129_vm3, %v1067_v0, %v1145_v5 }
 0x2ff   : > { %v1164_v14 = vsel %vm1132_vm4, %v1078_v3, %v1148_v10 }
 0x300   : > { %v1179_v23 = vpack.c.bf16 %v1164_v14, %v1163_v9  ;;  %v1162_v28 = vsel %vm1130_vm5, %v1070_v6, %v1146_v8  ;;  %v1490_v31 = vpop.f32.mrb[20].mxu0 }
 0x301   : > { %v1178_v32 = vpack.c.bf16 %v1162_v28, %v1161_v22  ;;  %v1091_v33 = vadd.f32 %v1490_v31, %v946_v59  ;;  %v1082_v11 = vpop.f32.mrb[21].mxu0  ;;  %v1188_v28 = vpop.permute.xlu0 %1187 }
 0x302   : > { %v1083_v12 = vadd.f32 %v1082_v11, %v938_v58  ;;  %v1491_v13 = vpop.f32.mrb[22].mxu0 }
 0x303   : > { %v1151_v15 = vmul.f32 0.01, %v1091_v33  ;;  %v1094_v16 = vadd.f32 %v1491_v13, %v950_v63  ;;  %v1085_v18 = vpop.f32.mrb[23].mxu0  ;;  %1501 = vmatpush3.bf16.msra.mxu1 %v1178_v32  ;;  %vm1135_vm6 = vcmp.gt.f32.partialorder %v1091_v33, 0.0 }
 0x304   : > { %v1149_v20 = vmul.f32 0.01, %v1083_v12  ;;  %v1086_v24 = vadd.f32 %v1085_v18, %v942_v56  ;;  %1502 = vmatprep.subr.bf16.mxu1 %v1665_v51  ;;  %vm1133_vm7 = vcmp.gt.f32.partialorder %v1083_v12, 0.0 }
 0x305   : > { %vm1136_vm8 = vcmp.gt.f32.partialorder %v1094_v16, 0.0  ;;  %v1152_v21 = vmul.f32 0.01, %v1094_v16  ;;  %v1167_v35 = vsel %vm1135_vm6, %v1091_v33, %v1151_v15 }
 0x306   : > { %vm1134_vm9 = vcmp.gt.f32.partialorder %v1086_v24, 0.0  ;;  %v1150_v26 = vmul.f32 0.01, %v1086_v24  ;;  %v1165_v36 = vsel %vm1133_vm7, %v1083_v12, %v1149_v20 }
 0x307   : > { %v1168_v25 = vsel %vm1136_vm8, %v1094_v16, %v1152_v21  ;;  %1503 = vmatpush3.bf16.msra.mxu1 %v1179_v23  ;;  %v1177_v23 = vld [vmem:[%s2033_s3] sm:$0x1] }
 0x308   : > { %v1181_v29 = vpack.c.bf16 %v1168_v25, %v1167_v35  ;;  %v1166_v27 = vsel %vm1134_vm9, %v1086_v24, %v1150_v26  ;;  %v1494_v37 = vpop.f32.mrb[24].mxu0  ;;  %1504 = vmatprep.subr.bf16.mxu1 %v1665_v51 }
 0x309   : > { %v1180_v30 = vpack.c.bf16 %v1166_v27, %v1165_v36  ;;  %v1107_v38 = vadd.f32 %v1494_v37, %v962_v19  ;;  %v1098_v39 = vpop.f32.mrb[25].mxu0 }
 0x30a   : > { %v1099_v41 = vadd.f32 %v1098_v39, %v954_v7  ;;  %v1495_v42 = vpop.f32.mrb[26].mxu0 }
 0x30b   : > { %v1155_v43 = vmul.f32 0.01, %v1107_v38  ;;  %v1110_v44 = vadd.f32 %v1495_v42, %v966_v34  ;;  %v1101_v45 = vpop.f32.mrb[27].mxu0  ;;  %1505 = vmatpush3.bf16.msra.mxu1 %v1180_v30  ;;  %vm1139_vm10 = vcmp.gt.f32.partialorder %v1107_v38, 0.0 }
 0x30c   : > { %v1153_v47 = vmul.f32 0.01, %v1099_v41  ;;  %v1102_v48 = vadd.f32 %v1101_v45, %v958_v17  ;;  %1506 = vmatprep.subr.bf16.mxu1 %v1665_v51  ;;  %vm1137_vm11 = vcmp.gt.f32.partialorder %v1099_v41, 0.0 }
 0x30d   : > { %vm1140_vm12 = vcmp.gt.f32.partialorder %v1110_v44, 0.0  ;;  %v1156_v49 = vmul.f32 0.01, %v1110_v44  ;;  %v1171_v52 = vsel %vm1139_vm10, %v1107_v38, %v1155_v43 }
 0x30e   : > { %vm1138_vm13 = vcmp.gt.f32.partialorder %v1102_v48, 0.0  ;;  %v1154_v50 = vmul.f32 0.01, %v1102_v48  ;;  %v1169_v55 = vsel %vm1137_vm11, %v1099_v41, %v1153_v47 }
 0x30f   : > { %v1172_v53 = vsel %vm1140_vm12, %v1110_v44, %v1156_v49  ;;  %1507 = vmatpush3.bf16.msra.mxu1 %v1181_v29 }
 0x310   : > { %v1183_v57 = vpack.c.bf16 %v1172_v53, %v1171_v52  ;;  %v1170_v58 = vsel %vm1138_vm13, %v1102_v48, %v1154_v50  ;;  %v1498_v56 = vpop.f32.mrb[28].mxu0  ;;  %1508 = vmatprep.subr.bf16.mxu1 %v1665_v51 }
 0x311   : > { %v1182_v59 = vpack.c.bf16 %v1170_v58, %v1169_v55  ;;  %v1123_v60 = vadd.f32 %v1498_v56, %v978_v54  ;;  %v1114_v61 = vpop.f32.mrb[29].mxu0 }
 0x312   : > { %v1115_v63 = vadd.f32 %v1114_v61, %v970_v40  ;;  %v1499_v0 = vpop.f32.mrb[30].mxu0 }
 0x313   : > { %v1159_v1 = vmul.f32 0.01, %v1123_v60  ;;  %v1126_v2 = vadd.f32 %v1499_v0, %v982_v62  ;;  %v1117_v3 = vpop.f32.mrb[31].mxu0  ;;  %1509 = vmatpush3.bf16.msra.mxu1 %v1182_v59  ;;  %vm1143_vm14 = vcmp.gt.f32.partialorder %v1123_v60, 0.0 }
 0x314   : > { %v1157_v4 = vmul.f32 0.01, %v1115_v63  ;;  %v1118_v5 = vadd.f32 %v1117_v3, %v974_v46  ;;  %1510 = vmatprep.subr.bf16.mxu1 %v1665_v51  ;;  %vm1141_vm15 = vcmp.gt.f32.partialorder %v1115_v63, 0.0 }
 0x315   : > { %vm1144_vm0 = vcmp.gt.f32.partialorder %v1126_v2, 0.0  ;;  %v1160_v6 = vmul.f32 0.01, %v1126_v2  ;;  %v1175_v7 = vsel %vm1143_vm14, %v1123_v60, %v1159_v1 }
 0x316   : > { %vm1142_vm1 = vcmp.gt.f32.partialorder %v1118_v5, 0.0  ;;  %v1158_v10 = vmul.f32 0.01, %v1118_v5  ;;  %v1173_v9 = vsel %vm1141_vm15, %v1115_v63, %v1157_v4 }
 0x317   : > { %v1176_v8 = vsel %vm1144_vm0, %v1126_v2, %v1160_v6  ;;  %1511 = vmatpush3.bf16.msra.mxu1 %v1183_v57 }
 0x318   : > { %v1185_v14 = vpack.c.bf16 %v1176_v8, %v1175_v7  ;;  %v1174_v17 = vsel %vm1142_vm1, %v1118_v5, %v1158_v10  ;;  %1512 = vmatprep.subr.bf16.mxu1 %v1665_v51 }
 0x319   : > { %v1184_v22 = vpack.c.bf16 %v1174_v17, %v1173_v9 }
 0x31b   : > { %1513 = vmatpush3.bf16.msra.mxu1 %v1184_v22 }
 0x31c   : > { %1514 = vmatprep.subr.bf16.mxu1 %v1665_v51 }
 0x31f   : > { %1515 = vmatpush3.bf16.msra.mxu1 %v1185_v14 }
 0x322   : > { %1517 = vmatmul.mubr.bf16.vlgmr.msra.gmra.mrb[16].mxu1 %v1177_v23 }
 0x3f5   : > { %v1224_v31 = vpop.f32.mrb[16].mxu1 }
 0x3f6   : > { %v1225_v32 = vadd.f32 %v1224_v31, %v1188_v28  ;;  %v1518_v33 = vpop.f32.mrb[17].mxu1 }
 0x3f7   : > { %v1227_v51 = vpop.f32.mrb[18].mxu1 }
 0x3f8   : > { %1230 = vst [vmem:[%s274_s7] sm:$0x1] %v1225_v32  ;;  %v1519_v11 = vpop.f32.mrb[19].mxu1 }
 0x3f9   : > { %1611 = shalt.err (!%p1608_p5)
}
 0x3fa   : > { %s1612_s12 = scalar_lea.hbm %s1986_s11, 16  ;;  %s1616_s25 = scalar_lea.hbm %s2035_s5, 32 }
 0x3fb   : > { %p1613_p7 = scmp.ne.s32.totalorder %s1986_s11, %s1612_s12  ;;  %p1617_p12 = scmp.lt.u32.totalorder %s1986_s11, %s2035_s5 }
 0x3fc   : > { %p1618_p13 = scmp.lt.u32.totalorder %s1616_s25, %s1612_s12  ;;  %p1620_p1 = scmp.lt.u32.totalorder %s1612_s12, %s1986_s11 }
 0x3fd   : > { %p1614_p10 = pnand %p1613_p7, %p1737_p6 }
 0x3fe   : > { %p1619_p0 = por %p1618_p13, %p1617_p12 }
 0x3ff   : > { %p1615_p11 = pneg %p1614_p10 }
 0x400   : > { %p1621_p2 = por %p1620_p1, %p1619_p0 }
 0x402   : > { %p1622_p3 = pnand %p1621_p2, %p1615_p11 }
 0x404   : > { %1625 = shalt.err (!%p1622_p3)
}
 0x405   : > { %1520 = dma.vmem_to_hbm [thread:$0]  (%p1737_p6), %s1988_s8, 16, %s1986_s11, %s1232_s13  }
 0x406 PF: > { %s1256_s6 = sand.u32 1, %s1648_s18   ;;  %p1523_p4 = pnand %p1307_p9, %p1741_p8 }
 0x407   : > { %s1257_s7 = scalar_lea.sflag [#allocation4], %s1256_s6 }
 0x408   : > { %1643 = dma.done.wait (!%p1523_p4), %s1257_s7, 16  }
 0x409   : > { %1645 = vsyncadd (!%p1523_p4), %s1257_s7, 4294967280  ;;  %p15_p5 = scmp.ge.s32.totalorder %s1722_s24, 4   ;;  %s2038_s18 = smov %s1652_s19 }
 0x40a   : > { %s2039_s19 = smov %s1656_s20  ;;  %s2040_s20 = smov %s1735_s27 }
 0x40b   : > { %s2041_s21 = smov %s1722_s24  ;;  %17 = sbr.rel (!%p15_p5) target bundleno = 3 (0x3), region = 122 }
 0x412   :  { %1261 = vsyncpa [#allocation4], 1 }
 0x413   :  { %1263 = vsyncpa [#allocation4 + $0x1], 1 }

</bundles_post_ra>
